<compile_context>
chip_gen: v7x
topology: tpu7x:2x2x1
jax: 0.10.0
libtpu: 0.0.40
codegen_flags: <defaults>
</compile_context>

<pallas_src>
import functools

import jax
import jax.numpy as jnp
from jax.experimental import pallas as pl
from jax.experimental.pallas import tpu as pltpu


def _round_up(x, m):
    return (x + m - 1) // m * m


def _edge_mlp_kernel(xiT_ref, xjT_ref, w1aT_ref, w1bT_ref, b1_ref, w2r_ref,
                     b2_ref, o_ref, *, sub):
    """One grid step = rows [i*TN, (i+1)*TN) of the batch, transposed layout.

    xiT_ref, xjT_ref : [C, TN]   input tiles (batch rows on the lane axis)
    w1aT_ref, w1bT_ref : [H, C]  layer-1 weight halves, transposed (resident)
    b1_ref             : [H, 1]  (resident)
    w2r_ref            : [1, H]  (resident)
    b2_ref             : [1]     (SMEM scalar)
    o_ref              : [1, TN] lane-dense output slab
    """
    tn = xiT_ref.shape[1]
    # Iterate the compute over lane sub-slices so the f32 hidden activation
    # stays ~1 MiB no matter how large the DMA tile (TN) is.  All slice bounds
    # are Python ints -> static slices (zero runtime indexing cost).
    for s0 in range(0, tn, sub):
        cur = min(sub, tn - s0)
        xi = xiT_ref[:, s0:s0 + cur]          # [C, cur]
        xj = xjT_ref[:, s0:s0 + cur]          # [C, cur]
        # Layer 1 with the concat folded in (exact identity):
        #   h^T = W1[:C]^T @ x_i^T + W1[C:]^T @ x_j^T + b1
        h = (jnp.dot(w1aT_ref[...], xi, preferred_element_type=jnp.float32)
             + jnp.dot(w1bT_ref[...], xj, preferred_element_type=jnp.float32)
             + b1_ref[...])                   # [H, cur] f32, lane-dense
        h = jnp.maximum(h, 0.0)               # ReLU
        # Layer 2: z^T = w2^T @ h^T -> [1, cur]; h is already [H, cur] so no
        # transpose/relayout is ever materialized.
        z = jnp.dot(w2r_ref[...], h, preferred_element_type=jnp.float32)
        z = z + b2_ref[0]                     # SMEM scalar bias
        o_ref[:, s0:s0 + cur] = jax.nn.sigmoid(z).astype(o_ref.dtype)


def edge_direction_predictor(x_i, x_j, w1, b1, w2, b2, *,
                             block_rows=65536, sub_rows=8192):
    """Fused EdgeDirectionPredictor forward.

    x_i, x_j : [N, C]   (float32 or bfloat16; bf16 halves HBM input traffic on
                         every TPU generation — accumulation stays f32)
    w1       : [2C, H]  (transposed PyTorch Linear(2C, H) weight)
    b1       : [H]
    w2       : [H, 1]   (transposed PyTorch Linear(H, 1) weight)
    b2       : [1]
    returns  : [N, 1] float32
    """
    n, c = x_i.shape
    assert x_j.shape == (n, c)
    two_c, hdim = w1.shape
    assert two_c == 2 * c

    in_dtype = x_i.dtype
    x_j = x_j.astype(in_dtype)

    # Weights stay f32 (tiny: <20 KiB); only the activations may be bf16.
    w1aT = jnp.asarray(w1[:c, :].T, dtype=jnp.float32)       # [H, C] (x_i half)
    w1bT = jnp.asarray(w1[c:, :].T, dtype=jnp.float32)       # [H, C] (x_j half)
    b1c = b1.reshape(hdim, 1).astype(jnp.float32)             # [H, 1]
    w2r = w2.reshape(1, hdim).astype(jnp.float32)             # [1, H]
    b2s = b2.reshape(1).astype(jnp.float32)                    # [1]   (SMEM)

    # ---- Row-tile selection -------------------------------------------------
    align = 512                                # lane alignment (multiple of 128)
    tn = _round_up(max(1, min(block_rows, n)), align)
    # Ragged-N guard: shrink the tile while zero-padding would exceed ~12.5%.
    while tn > align and (_round_up(n, tn) - n) * 8 > n:
        tn = _round_up(tn // 2, align)
    n_pad = _round_up(n, tn)
    grid = (n_pad // tn,)
    sub = min(tn, _round_up(max(1, sub_rows), 128))   # in-kernel compute chunk

    # Transposed activation layout [C, N]: batch rows on the lane axis, so the
    # HBM->VMEM DMA and every in-kernel tile are dense (no 4->128 lane padding,
    # no 32x VMEM inflation), which is what lets TN be 64K+ rows per step.
    pad = ((0, 0), (0, n_pad - n))
    xiT = jnp.pad(jnp.swapaxes(x_i, 0, 1), pad)
    xjT = jnp.pad(jnp.swapaxes(x_j, 0, 1), pad)

    in_bytes = jnp.dtype(in_dtype).itemsize
    cost = pl.CostEstimate(
        flops=2 * n_pad * hdim * (2 * c + 1),
        transcendentals=n_pad,
        bytes_accessed=n_pad * (2 * c * in_bytes + 4)
        + (2 * c * hdim + 2 * hdim + 1) * 4,
    )

    kernel = functools.partial(_edge_mlp_kernel, sub=sub)

    out2d = pl.pallas_call(
        kernel,
        out_shape=jax.ShapeDtypeStruct((1, n_pad), jnp.float32),
        grid_spec=pltpu.PrefetchScalarGridSpec(
            num_scalar_prefetch=0,
            grid=grid,
            in_specs=[
                pl.BlockSpec((c, tn), lambda i: (0, i)),          # x_i^T tile
                pl.BlockSpec((c, tn), lambda i: (0, i)),          # x_j^T tile
                pl.BlockSpec((hdim, c), lambda i: (0, 0)),        # W1a^T (resident)
                pl.BlockSpec((hdim, c), lambda i: (0, 0)),        # W1b^T (resident)
                pl.BlockSpec((hdim, 1), lambda i: (0, 0)),        # b1    (resident)
                pl.BlockSpec((1, hdim), lambda i: (0, 0)),        # w2^T  (resident)
                pl.BlockSpec(memory_space=pltpu.MemorySpace.SMEM),  # b2 scalar
            ],
            out_specs=pl.BlockSpec((1, tn), lambda i: (0, i)),    # lane-dense rows
        ),
        compiler_params=pltpu.CompilerParams(
            # TODO(synk): on v7x switch this axis to pltpu.CORE_PARALLEL (or use
            # pl.core_map over a tensorcore mesh) to split the row loop over
            # both TensorCores; "parallel" is kept here for portability.
            dimension_semantics=("parallel",),
            vmem_limit_bytes=48 * 1024 * 1024,
        ),
        cost_estimate=cost,
    )(xiT, xjT, w1aT, w1bT, b1c, w2r, b2s)

    # Padded rows produce garbage that is sliced off here; never read past :n.
    return out2d[0, :n].reshape(n, 1)


if __name__ == "__main__":
    # Small shapes consistent with the module: in_channels=4, hidden_dim=32.
    N, C, H = 8, 4, 32

    key = jax.random.PRNGKey(0)
    k_xi, k_xj, k_w1, k_b1, k_w2, k_b2 = jax.random.split(key, 6)

    x_i = jax.random.normal(k_xi, (N, C), dtype=jnp.float32)
    x_j = jax.random.normal(k_xj, (N, C), dtype=jnp.float32)

    # Deterministic synthetic parameters (PyTorch Linear shapes, stored transposed).
    w1 = jax.random.normal(k_w1, (2 * C, H), dtype=jnp.float32) * 0.1  # Linear(2C, H)
    b1 = jax.random.normal(k_b1, (H,), dtype=jnp.float32) * 0.1
    w2 = jax.random.normal(k_w2, (H, 1), dtype=jnp.float32) * 0.1      # Linear(H, 1)
    b2 = jax.random.normal(k_b2, (1,), dtype=jnp.float32) * 0.1

    def ref_fwd(xi, xj):
        x_cat = jnp.concatenate([xi, xj], axis=1)
        return jax.nn.sigmoid(jnp.maximum(x_cat @ w1 + b1, 0.0) @ w2 + b2)

    # 1) Small f32 case (single grid step, single compute chunk).
    out = jax.block_until_ready(edge_direction_predictor(x_i, x_j, w1, b1, w2, b2))
    assert out.shape == (N, 1)
    assert jnp.allclose(out, ref_fwd(x_i, x_j), atol=1e-4, rtol=1e-4)

    # 2) Multi-tile ragged N + multi-chunk inner loop (exercises the grid,
    #    resident weights, the pad/slice path and the sub-slice compute loop).
    N2 = 1000
    k_a, k_b = jax.random.split(jax.random.PRNGKey(1))
    xi2 = jax.random.normal(k_a, (N2, C), dtype=jnp.float32)
    xj2 = jax.random.normal(k_b, (N2, C), dtype=jnp.float32)
    out2 = jax.block_until_ready(
        edge_direction_predictor(xi2, xj2, w1, b1, w2, b2,
                                 block_rows=512, sub_rows=128))
    assert out2.shape == (N2, 1)
    assert jnp.allclose(out2, ref_fwd(xi2, xj2), atol=1e-4, rtol=1e-4)

    # 3) bf16 activations (halves the dominant HBM read on every generation);
    #    weights stay f32 and accumulation is f32, so the looser tolerance
    #    reflects only the input rounding.
    out3 = jax.block_until_ready(
        edge_direction_predictor(x_i.astype(jnp.bfloat16),
                                 x_j.astype(jnp.bfloat16), w1, b1, w2, b2))
    assert out3.shape == (N, 1)
    assert jnp.allclose(out3, ref_fwd(x_i, x_j), atol=2e-2, rtol=2e-2)

    print("KERNEL_OK")
</pallas_src>

<mosaic_0001>
module attributes {stable_mosaic.version = 11 : i64} {
  func.func @_edge_mlp_kernel(%arg0: i32, %arg1: memref<4x512xf32, #tpu.memory_space<vmem>>, %arg2: memref<4x512xf32, #tpu.memory_space<vmem>>, %arg3: memref<32x4xf32, #tpu.memory_space<vmem>>, %arg4: memref<32x4xf32, #tpu.memory_space<vmem>>, %arg5: memref<32x1xf32, #tpu.memory_space<vmem>>, %arg6: memref<1x32xf32, #tpu.memory_space<vmem>>, %arg7: memref<1xf32, #tpu.memory_space<smem>>, %arg8: memref<1x512xf32, #tpu.memory_space<vmem>>) attributes {dimension_semantics = [#tpu.dimension_semantics<parallel>], iteration_bounds = array<i64: 1>, scalar_prefetch = 0 : i64, scratch_operands = 0 : i64, tpu.core_type = #tpu.core_type<tc>, window_params = [{transform_indices = @transform_0, window_bounds = array<i64: 4, 512>}, {transform_indices = @transform_1, window_bounds = array<i64: 4, 512>}, {pipeline_mode = #tpu.pipeline_mode<synchronous>, transform_indices = @transform_2, window_bounds = array<i64: 32, 4>}, {pipeline_mode = #tpu.pipeline_mode<synchronous>, transform_indices = @transform_3, window_bounds = array<i64: 32, 4>}, {pipeline_mode = #tpu.pipeline_mode<synchronous>, transform_indices = @transform_4, window_bounds = array<i64: 32, 1>}, {pipeline_mode = #tpu.pipeline_mode<synchronous>, transform_indices = @transform_5, window_bounds = array<i64: 1, 32>}, {transform_indices = @transform_6, window_bounds = array<i64: 1>}, {transform_indices = @transform_7, window_bounds = array<i64: 1, 512>}]} {
    %c0 = arith.constant 0 : index
    %c0_0 = arith.constant 0 : index
    %0 = vector.load %arg1[%c0, %c0_0] : memref<4x512xf32, #tpu.memory_space<vmem>>, vector<4x512xf32>
    %c0_1 = arith.constant 0 : index
    %c0_2 = arith.constant 0 : index
    %1 = vector.load %arg2[%c0_1, %c0_2] : memref<4x512xf32, #tpu.memory_space<vmem>>, vector<4x512xf32>
    %c0_3 = arith.constant 0 : index
    %c0_4 = arith.constant 0 : index
    %2 = vector.load %arg3[%c0_3, %c0_4] : memref<32x4xf32, #tpu.memory_space<vmem>>, vector<32x4xf32>
    %cst = arith.constant dense<0.000000e+00> : vector<32x512xf32>
    %3 = tpu.matmul %2, %0, %cst {dimension_numbers = #tpu.dot_dimension_numbers<[1], [0], [0], [1], [0, 0, 1, 1], [], []>} : vector<32x4xf32>, vector<4x512xf32>, vector<32x512xf32> -> vector<32x512xf32>
    %c0_5 = arith.constant 0 : index
    %c0_6 = arith.constant 0 : index
    %4 = vector.load %arg4[%c0_5, %c0_6] : memref<32x4xf32, #tpu.memory_space<vmem>>, vector<32x4xf32>
    %cst_7 = arith.constant dense<0.000000e+00> : vector<32x512xf32>
    %5 = tpu.matmul %4, %1, %cst_7 {dimension_numbers = #tpu.dot_dimension_numbers<[1], [0], [0], [1], [0, 0, 1, 1], [], []>} : vector<32x4xf32>, vector<4x512xf32>, vector<32x512xf32> -> vector<32x512xf32>
    %6 = arith.addf %3, %5 : vector<32x512xf32>
    %c0_8 = arith.constant 0 : index
    %c0_9 = arith.constant 0 : index
    %7 = vector.load %arg5[%c0_8, %c0_9] : memref<32x1xf32, #tpu.memory_space<vmem>>, vector<32x1xf32>
    %8 = vector.broadcast %7 : vector<32x1xf32> to vector<32x512xf32>
    %9 = arith.addf %6, %8 : vector<32x512xf32>
    %cst_10 = arith.constant 0.000000e+00 : f32
    %10 = vector.broadcast %cst_10 : f32 to vector<32x512xf32>
    %11 = arith.maximumf %9, %10 : vector<32x512xf32>
    %c0_11 = arith.constant 0 : index
    %c0_12 = arith.constant 0 : index
    %12 = vector.load %arg6[%c0_11, %c0_12] : memref<1x32xf32, #tpu.memory_space<vmem>>, vector<1x32xf32>
    %cst_13 = arith.constant dense<0.000000e+00> : vector<1x512xf32>
    %13 = tpu.matmul %12, %11, %cst_13 {dimension_numbers = #tpu.dot_dimension_numbers<[1], [0], [0], [1], [0, 0, 1, 1], [], []>} : vector<1x32xf32>, vector<32x512xf32>, vector<1x512xf32> -> vector<1x512xf32>
    %c0_14 = arith.constant 0 : index
    %14 = memref.load %arg7[%c0_14] : memref<1xf32, #tpu.memory_space<smem>>
    %15 = vector.broadcast %14 : f32 to vector<1x512xf32>
    %16 = arith.addf %13, %15 : vector<1x512xf32>
    %17 = arith.negf %16 : vector<1x512xf32>
    %18 = math.exp %17 : vector<1x512xf32>
    %cst_15 = arith.constant 1.000000e+00 : f32
    %19 = vector.broadcast %cst_15 : f32 to vector<1x512xf32>
    %20 = arith.addf %19, %18 : vector<1x512xf32>
    %21 = arith.divf %19, %20 : vector<1x512xf32>
    %c0_16 = arith.constant 0 : index
    %c0_17 = arith.constant 0 : index
    %22 = vector.load %arg8[%c0_16, %c0_17] : memref<1x512xf32, #tpu.memory_space<vmem>>, vector<1x512xf32>
    tpu.vector_store %arg8[%c0_16, %c0_17], %21 {strides = array<i32>} : memref<1x512xf32, #tpu.memory_space<vmem>>, vector<1x512xf32>,
    return
  }
  func.func @transform_0(%arg0: i32) -> (i32, i32) {
    %c0_i32 = arith.constant 0 : i32
    %c0_i32_0 = arith.constant 0 : i32
    return %c0_i32, %arg0 : i32, i32
  }
  func.func @transform_1(%arg0: i32) -> (i32, i32) {
    %c0_i32 = arith.constant 0 : i32
    %c0_i32_0 = arith.constant 0 : i32
    return %c0_i32, %arg0 : i32, i32
  }
  func.func @transform_2(%arg0: i32) -> (i32, i32) {
    %c0_i32 = arith.constant 0 : i32
    %c0_i32_0 = arith.constant 0 : i32
    %c0_i32_1 = arith.constant 0 : i32
    return %c0_i32, %c0_i32_0 : i32, i32
  }
  func.func @transform_3(%arg0: i32) -> (i32, i32) {
    %c0_i32 = arith.constant 0 : i32
    %c0_i32_0 = arith.constant 0 : i32
    %c0_i32_1 = arith.constant 0 : i32
    return %c0_i32, %c0_i32_0 : i32, i32
  }
  func.func @transform_4(%arg0: i32) -> (i32, i32) {
    %c0_i32 = arith.constant 0 : i32
    %c0_i32_0 = arith.constant 0 : i32
    %c0_i32_1 = arith.constant 0 : i32
    return %c0_i32, %c0_i32_0 : i32, i32
  }
  func.func @transform_5(%arg0: i32) -> (i32, i32) {
    %c0_i32 = arith.constant 0 : i32
    %c0_i32_0 = arith.constant 0 : i32
    %c0_i32_1 = arith.constant 0 : i32
    return %c0_i32, %c0_i32_0 : i32, i32
  }
  func.func @transform_6(%arg0: i32) -> i32 {
    %c0_i32 = arith.constant 0 : i32
    %c0_i32_0 = arith.constant 0 : i32
    return %c0_i32 : i32
  }
  func.func @transform_7(%arg0: i32) -> (i32, i32) {
    %c0_i32 = arith.constant 0 : i32
    %c0_i32_0 = arith.constant 0 : i32
    return %c0_i32, %arg0 : i32, i32
  }
}

</mosaic_0001>

<bundles_post_ra>
// kernel: tpu_custom_call.1
= control target key start
LH: loop header
LB: loop body
LE: loop exit
PB: predicated region body
PF: predicated region fallthrough
CT: control target
= control target key end

     0   :  { %vm57_vm0 = vcmask 1043456   ;;  %v835_v4 = vmov 0.0   ;;  %vm44_vm1 = vcmask 31744   ;;  %v836_v8 = vmov 0   ;;  %s987_s0 = inlined_call_operand.vmem [shape: f32[4,512], index: 0, kind: input, shape index: {}]   ;;  %s988_s1 = inlined_call_operand.vmem [shape: f32[4,512], index: 1, kind: input, shape index: {}]   ;;  %s989_s2 = inlined_call_operand.vmem [shape: f32[32,4], index: 2, kind: input, shape index: {}]   ;;  %s990_s3 = inlined_call_operand.vmem [shape: f32[32,4], index: 3, kind: input, shape index: {}]   ;;  %s991_s4 = inlined_call_operand.vmem [shape: f32[32,1], index: 4, kind: input, shape index: {}]   ;;  %s992_s5 = inlined_call_operand.vmem [shape: f32[1,32], index: 5, kind: input, shape index: {}]   ;;  %s993_s6 = inlined_call_operand.<no memory space> [shape: f32[1], index: 6, kind: input, shape index: {}]   ;;  %s994_s7 = inlined_call_operand.hbm [shape: f32[1,512], index: 7, kind: output, shape index: {}]  }
   0x1   :  { %v30_v0 = vld [vmem:[%s988_s1] sm:$0xff]  ;;  %v31_v1 = vld [vmem:[%s988_s1 + $0x8] sm:$0xff]  ;;  %130 = vmatprep.mubr.f32.mxu0 %v835_v4  ;;  %219 = vmatprep.mubr.f32.mxu1 %v835_v4 }
   0x2   :  { %v42_v2 = vcombine.high %v30_v0, %v30_v0  ;;  %v43_v3 = vcombine.high %v31_v1, %v31_v1  ;;  %v28_v5 = vld [vmem:[%s987_s0] sm:$0xff]  ;;  %v29_v6 = vld [vmem:[%s987_s0 + $0x8] sm:$0xff]  ;;  %789 = vset.pattern.permute.xlu0 %v836_v8  ;;  %790 = vset.pattern.permute.xlu1 %v836_v8 }
   0x3   :  { %v36_v7 = vld [vmem:[%s990_s3] sm:$0xff]  ;;  %v246_v9 = vcombine.high %v28_v5, %v28_v5  ;;  %v247_v10 = vcombine.high %v29_v6, %v29_v6 }
   0x4   :  { %723 = vmatprep.subr.msk.mxu0 %vm57_vm0, %v42_v2  ;;  %729 = vmatprep.subr.msk.mxu1 %vm57_vm0, %v43_v3 }
   0x5   :  { %724 = vmatpush1.msk.msra.mxu0 %vm57_vm0, %v30_v0  ;;  %730 = vmatpush1.msk.msra.mxu1 %vm57_vm0, %v31_v1 }
   0x6   :  { %725 = vmatmul.mubr.msk.f32.vlgmr.msra.gmra.mrb[0].mxu0 %vm44_vm1, %v36_v7  ;;  %731 = vmatmul.mubr.msk.f32.vlgmr.msra.gmra.mrb[0].mxu1 %vm44_vm1, %v36_v7 }
   0x7   :  { %13 = vsyncpa [#allocation4], 0  ;;  %136 = vmatprep.mubr.f32.mxu0 %v835_v4  ;;  %225 = vmatprep.mubr.f32.mxu1 %v835_v4  ;;  %v37_v11 = vld [vmem:[%s990_s3 + $0x8] sm:$0xff]  ;;  %v446_v12 = vld [vmem:[%s991_s4] sm:$0xff]  ;;  %vm505_vm2 = vcmask 261120  }
   0x8   :  { %735 = vmatprep.subr.msk.mxu0 %vm57_vm0, %v246_v9  ;;  %741 = vmatprep.subr.msk.mxu1 %vm57_vm0, %v247_v10  ;;  %v448_v13 = vld [vmem:[%s991_s4 + $0x10] sm:$0xff]  ;;  %v447_v15 = vld [vmem:[%s991_s4 + $0x8] sm:$0xff]  ;;  %v449_v16 = vld [vmem:[%s991_s4 + $0x18] sm:$0xff] }
   0x9   :  { %736 = vmatpush1.msk.msra.mxu0 %vm57_vm0, %v28_v5  ;;  %742 = vmatpush1.msk.msra.mxu1 %vm57_vm0, %v29_v6  ;;  %v38_v14 = vld [vmem:[%s990_s3 + $0x10] sm:$0xff]  ;;  %v39_v17 = vld [vmem:[%s990_s3 + $0x18] sm:$0xff]  ;;  %v32_v18 = vld [vmem:[%s989_s2] sm:$0xff] }
   0xa   :  { %726 = vmatmul.mubr.msk.f32.gmra.mrb[2].mxu0 %vm44_vm1, %v37_v11  ;;  %732 = vmatmul.mubr.msk.f32.gmra.mrb[2].mxu1 %vm44_vm1, %v37_v11  ;;  %v33_v19 = vld [vmem:[%s989_s2 + $0x8] sm:$0xff]  ;;  %v34_v20 = vld [vmem:[%s989_s2 + $0x10] sm:$0xff]  ;;  %v35_v21 = vld [vmem:[%s989_s2 + $0x18] sm:$0xff] }
   0xb   :  { %142 = vmatprep.mubr.f32.mxu0 %v835_v4  ;;  %231 = vmatprep.mubr.f32.mxu1 %v835_v4 }
   0xc   :  { %452 = vperm.xlu0 %789, %v446_v12   ;;  %462 = vperm.xlu1 %790, %v448_v13  }
   0xe   :  { %727 = vmatmul.mubr.msk.f32.gmra.mrb[4].mxu0 %vm44_vm1, %v38_v14  ;;  %733 = vmatmul.mubr.msk.f32.gmra.mrb[4].mxu1 %vm44_vm1, %v38_v14 }
   0xf   :  { %148 = vmatprep.mubr.f32.mxu0 %v835_v4  ;;  %237 = vmatprep.mubr.f32.mxu1 %v835_v4 }
  0x10   :  { %457 = vperm.xlu0 %789, %v447_v15   ;;  %467 = vperm.xlu1 %790, %v449_v16  }
  0x12   :  { %728 = vmatmul.mubr.msk.f32.gmra.mrb[6].mxu0 %vm44_vm1, %v39_v17  ;;  %734 = vmatmul.mubr.msk.f32.gmra.mrb[6].mxu1 %vm44_vm1, %v39_v17 }
  0x13   :  { %332 = vmatprep.mubr.f32.mxu0 %v835_v4  ;;  %421 = vmatprep.mubr.f32.mxu1 %v835_v4 }
  0x16   :  { %737 = vmatmul.mubr.msk.f32.vlgmr.msra.gmra.mrb[0].mxu0 %vm44_vm1, %v32_v18  ;;  %743 = vmatmul.mubr.msk.f32.vlgmr.msra.gmra.mrb[0].mxu1 %vm44_vm1, %v32_v18  ;;  %v502_v18 = vld [vmem:[%s992_s5] sm:$0x1]  ;;  %s838_s5 = smov [#allocation3]  }
  0x17   :  { %338 = vmatprep.mubr.f32.mxu0 %v835_v4  ;;  %427 = vmatprep.mubr.f32.mxu1 %v835_v4 }
  0x1a   :  { %738 = vmatmul.mubr.msk.f32.gmra.mrb[2].mxu0 %vm44_vm1, %v33_v19  ;;  %744 = vmatmul.mubr.msk.f32.gmra.mrb[2].mxu1 %vm44_vm1, %v33_v19  ;;  %v504_v19 = vstv %s993_s6  ;;  %s715_s6 = sshll.u32 %s838_s5, 4  ;;  %s716_s6 = int_to_ptr.vmem [resolvable:$true] %s715_s6 }
  0x1b   :  { %344 = vmatprep.mubr.f32.mxu0 %v835_v4  ;;  %433 = vmatprep.mubr.f32.mxu1 %v835_v4  ;;  %s811_s9 = scalar_lea.vmem %s716_s6, 64  ;;  %p816_p1 = scmp.lt.s32.totalorder %s716_s6, %s716_s6 }
  0x1c   :  { %p812_p0 = scmp.ne.s32.totalorder %s716_s6, %s811_s9  ;;  %p817_p2 = scmp.lt.s32.totalorder %s811_s9, %s811_s9 }
  0x1e   :  { %739 = vmatmul.mubr.msk.f32.gmra.mrb[4].mxu0 %vm44_vm1, %v34_v20  ;;  %745 = vmatmul.mubr.msk.f32.gmra.mrb[4].mxu1 %vm44_vm1, %v34_v20  ;;  %p818_p3 = por %p817_p2, %p816_p1 }
  0x1f   :  { %350 = vmatprep.mubr.f32.mxu0 %v835_v4  ;;  %439 = vmatprep.mubr.f32.mxu1 %v835_v4 }
  0x20   :  { %p819_p4 = pnand %p818_p3, %p812_p0 }
  0x22   :  { %740 = vmatmul.mubr.msk.f32.gmra.mrb[6].mxu0 %vm44_vm1, %v35_v21  ;;  %746 = vmatmul.mubr.msk.f32.gmra.mrb[6].mxu1 %vm44_vm1, %v35_v21 }
  0x23   :  { %573 = vmatprep.mubr.f32.mxu0 %v835_v4  ;;  %644 = vmatprep.mubr.f32.mxu1 %v835_v4 }
  0x8b   :  { %v453_v22 = vpop.permute.xlu0 %452  ;;  %v463_v30 = vpop.permute.xlu1 %462 }
  0x8f   :  { %v458_v27 = vpop.permute.xlu0 %457  ;;  %v468_v59 = vpop.permute.xlu1 %467 }
  0xe9   :  { %v334_v23 = vpop.f32.mrb[0].mxu0  ;;  %v423_v24 = vpop.f32.mrb[0].mxu1 }
  0xea   :  { %v336_v25 = vpop.f32.mrb[1].mxu0  ;;  %v425_v26 = vpop.f32.mrb[1].mxu1  ;;  %v470_v28 = vadd.f32 %v453_v22, %v334_v23  ;;  %v472_v29 = vadd.f32 %v453_v22, %v423_v24 }
  0xeb   :  { %v471_v31 = vadd.f32 %v453_v22, %v336_v25  ;;  %v473_v32 = vadd.f32 %v453_v22, %v425_v26 }
  0xec   :  { %v486_v41 = vmax.f32 %v470_v28, 0.0  ;;  %v488_v42 = vmax.f32 %v472_v29, 0.0 }
  0xed   :  { %v340_v33 = vpop.f32.mrb[2].mxu0  ;;  %v429_v34 = vpop.f32.mrb[2].mxu1  ;;  %v487_v45 = vmax.f32 %v471_v31, 0.0  ;;  %v489_v46 = vmax.f32 %v473_v32, 0.0 }
  0xee   :  { %v474_v35 = vadd.f32 %v458_v27, %v340_v33  ;;  %v476_v36 = vadd.f32 %v458_v27, %v429_v34  ;;  %v342_v37 = vpop.f32.mrb[3].mxu0  ;;  %v431_v38 = vpop.f32.mrb[3].mxu1 }
  0xef   :  { %v475_v39 = vadd.f32 %v458_v27, %v342_v37  ;;  %v477_v40 = vadd.f32 %v458_v27, %v431_v38 }
  0xf0   :  { %v490_v43 = vmax.f32 %v474_v35, 0.0  ;;  %v492_v44 = vmax.f32 %v476_v36, 0.0 }
  0xf1   :  { %v491_v47 = vmax.f32 %v475_v39, 0.0  ;;  %v493_v48 = vmax.f32 %v477_v40, 0.0  ;;  %v346_v49 = vpop.f32.mrb[4].mxu0  ;;  %v435_v50 = vpop.f32.mrb[4].mxu1  ;;  %v837_v40 = vmov 1966171168  }
  0xf2   :  { %v755_v51 = vpack.c.bf16 %v490_v43, %v486_v41  ;;  %v763_v52 = vpack.c.bf16 %v492_v44, %v488_v42  ;;  %v348_v53 = vpop.f32.mrb[5].mxu0  ;;  %v437_v54 = vpop.f32.mrb[5].mxu1  ;;  %v478_v57 = vadd.f32 %v463_v30, %v346_v49  ;;  %v480_v58 = vadd.f32 %v463_v30, %v435_v50 }
  0xf3   :  { %v753_v55 = vpack.c.bf16 %v491_v47, %v487_v45  ;;  %v761_v56 = vpack.c.bf16 %v493_v48, %v489_v46  ;;  %v479_v60 = vadd.f32 %v463_v30, %v348_v53  ;;  %v481_v61 = vadd.f32 %v463_v30, %v437_v54 }
  0xf4   :  { %v494_v6 = vmax.f32 %v478_v57, 0.0  ;;  %v496_v7 = vmax.f32 %v480_v58, 0.0  ;;  %v682_v41 = vunpack.c.l.s4 %v837_v40  ;;  %v684_v42 = vlaneseq }
  0xf5   :  { %v352_v62 = vpop.f32.mrb[6].mxu0  ;;  %v441_v63 = vpop.f32.mrb[6].mxu1  ;;  %754 = vmatprep.subr.bf16.mxu0 %v753_v55  ;;  %762 = vmatprep.subr.bf16.mxu1 %v761_v56  ;;  %v495_v10 = vmax.f32 %v479_v60, 0.0  ;;  %v497_v11 = vmax.f32 %v481_v61, 0.0 }
  0xf6   :  { %v482_v0 = vadd.f32 %v468_v59, %v352_v62  ;;  %v484_v1 = vadd.f32 %v468_v59, %v441_v63  ;;  %v354_v2 = vpop.f32.mrb[7].mxu0  ;;  %v443_v3 = vpop.f32.mrb[7].mxu1  ;;  %756 = vmatpush1.bf16.msra.mxu0 %v755_v51  ;;  %764 = vmatpush1.bf16.msra.mxu1 %v763_v52  ;;  %v683_v43 = vunpack.c.0.s8 %v682_v41  ;;  %v685_v44 = vshrl.u32 %v684_v42, 7 }
  0xf7   :  { %v483_v4 = vadd.f32 %v468_v59, %v354_v2  ;;  %v485_v5 = vadd.f32 %v468_v59, %v443_v3  ;;  %vm706_vm3 = vcmp.lt.s32.totalorder %v684_v42, 512 }
  0xf8   :  { %v498_v8 = vmax.f32 %v482_v0, 0.0  ;;  %v500_v9 = vmax.f32 %v484_v1, 0.0  ;;  %v686_v47 = vsub.s32 %v683_v43, %v685_v44 }
  0xf9   :  { %v499_v12 = vmax.f32 %v483_v4, 0.0  ;;  %v501_v13 = vmax.f32 %v485_v5, 0.0 }
  0xfa   :  { %v759_v14 = vpack.c.bf16 %v498_v8, %v494_v6  ;;  %v767_v15 = vpack.c.bf16 %v500_v9, %v496_v7 }
  0xfb   :  { %v757_v16 = vpack.c.bf16 %v499_v12, %v495_v10  ;;  %v765_v17 = vpack.c.bf16 %v501_v13, %v497_v11 }
  0xfd   :  { %758 = vmatprep.subr.bf16.mxu0 %v757_v16  ;;  %766 = vmatprep.subr.bf16.mxu1 %v765_v17 }
  0xfe   :  { %760 = vmatpush1.bf16.msra.mxu0 %v759_v14  ;;  %768 = vmatpush1.bf16.msra.mxu1 %v767_v15 }
 0x101   :  { %747 = vmatmul.mubr.msk.f32.vlgmr.msra.gmra.mrb[8].mxu0 %vm505_vm2, %v502_v18  ;;  %748 = vmatmul.mubr.msk.f32.vlgmr.msra.gmra.mrb[8].mxu1 %vm505_vm2, %v502_v18 }
 0x1d4   :  { %v575_v20 = vpop.f32.mrb[8].mxu0  ;;  %v646_v21 = vpop.f32.mrb[8].mxu1 }
 0x1d5   :  { %v576_v22 = vadd.f32 %v575_v20, %v504_v19  ;;  %v647_v23 = vadd.f32 %v646_v21, %v504_v19  ;;  %v577_v24 = vpop.f32.mrb[9].mxu0  ;;  %v648_v25 = vpop.f32.mrb[9].mxu1 }
 0x1d6   :  { %v578_v26 = vadd.f32 %v577_v24, %v504_v19  ;;  %v649_v27 = vadd.f32 %v648_v25, %v504_v19 }
 0x1d7   :  { %v749_v28 = vmul.f32 -1.442695, %v576_v22  ;;  %v751_v29 = vmul.f32 -1.442695, %v647_v23 }
 0x1d8   :  { %v750_v30 = vmul.f32 -1.442695, %v578_v26  ;;  %v752_v31 = vmul.f32 -1.442695, %v649_v27 }
 0x1d9   :  { %795 = vpow2.f32 %v749_v28 }
 0x1da   :  { %797 = vpow2.f32 %v751_v29 }
 0x1db   :  { %799 = vpow2.f32 %v750_v30 }
 0x1dc   :  { %801 = vpow2.f32 %v752_v31 }
 0x1e3   :  { %v796_v32 = vpop.eup %795 }
 0x1e4   :  { %v798_v33 = vpop.eup %797  ;;  %v663_v34 = vadd.f32 1.0, %v796_v32 }
 0x1e5   :  { %v800_v35 = vpop.eup %799  ;;  %v665_v36 = vadd.f32 1.0, %v798_v33 }
 0x1e6   :  { %v802_v37 = vpop.eup %801  ;;  %803 = vrcp.f32 %v663_v34  ;;  %v664_v38 = vadd.f32 1.0, %v800_v35 }
 0x1e7   :  { %805 = vrcp.f32 %v665_v36  ;;  %v666_v39 = vadd.f32 1.0, %v802_v37 }
 0x1e8   :  { %807 = vrcp.f32 %v664_v38 }
 0x1e9   :  { %809 = vrcp.f32 %v666_v39 }
 0x1f0   :  { %v804_v45 = vpop.eup %803 }
 0x1f1   :  { %v806_v46 = vpop.eup %805 }
 0x1f2   :  { %v808_v48 = vpop.eup %807 }
 0x1f3   :  { %v810_v49 = vpop.eup %809  ;;  %v679_v50 = vcombine.low %v804_v45, %v808_v48 }
 0x1f4   :  { %v680_v51 = vcombine.low %v806_v46, %v810_v49 }
 0x1f5   :  { %v687_v52 = vrot.slane %v679_v50, %v686_v47 }
 0x1f6   :  { %v694_v53 = vrot.slane %v680_v51, %v686_v47 }
 0x1f8   :  { %v695_v54 = vcombine.low %v687_v52, %v694_v53 }
 0x1fa   :  { %v702_v55 = vrot.slane %v695_v54, %v686_v47 }
 0x1fc   :  { %708 = vst.msk [vmem:[#allocation3] sm:$0xf] %vm706_vm3, %v702_v55 }
 0x1fd   :  { %822 = shalt.err (!%p819_p4)
}
 0x1fe   :  { %s823_s1 = scalar_lea.hbm %s994_s7, 64 }
 0x1ff   :  { %p824_p5 = scmp.ne.s32.totalorder %s994_s7, %s823_s1  ;;  %p827_p6 = scmp.lt.u32.totalorder %s823_s1, %s994_s7 }
 0x201   :  { %p829_p7 = pnand %p827_p6, %p824_p5 }
 0x203   :  { %832 = shalt.err (!%p829_p7)
}
 0x204   :  { %718 = dma.vmem_to_hbm [thread:$0]  %s716_s6, 64, %s994_s7, [#allocation4]  }
 0x205   :  { %833 = dma.done.wait [#allocation4], 64  }
 0x206   :  { %834 = vsyncadd [#allocation4], 4294967232 }
 0x207   :  { %722 = vsyncpa [#allocation4], 1 }

</bundles_post_ra>
